<compile_context>
chip_gen: v7x
topology: tpu7x:2x2x1
jax: 0.10.0
libtpu: 0.0.40
codegen_flags: <defaults>
</compile_context>

<pallas_src>
import functools

import jax
import jax.numpy as jnp
from jax import lax
from jax.experimental import pallas as pl
from jax.experimental.pallas import tpu as pltpu


_NEG = -3.0e38            # "-inf" fill for the segment max
_NEG_THRESH = -1.0e38     # anything <= this means "no point hit this voxel"
_SENTINEL = 2 ** 30       # voxel id for padded point rows (never matches a slot)


def _round_up(n, m):
    return -(-n // m) * m


def _pick_tile(n_rows, tile_max, mult):
    """Largest tile <= tile_max (multiple of `mult`) that still yields >=2 grid
    steps on the parallel axis when the problem allows it (v7x has 2 TCs)."""
    half = _round_up(max(-(-n_rows // 2), 1), mult)
    return int(max(mult, min(tile_max, half)))


def _pad_wb(w, b, pad_k=True):
    """Pad a (K, C) weight / (C,) bias.  C is always padded to 128 (lane-dense
    stores); K is padded to 128 only for hidden layers (pad_k) -- the first
    layer keeps the true input width (rounded to a sublane multiple of 8) so
    the big point-feature stream is not inflated 8x."""
    K, C = w.shape
    Kp = _round_up(K, 128) if pad_k else _round_up(K, 8)
    Cp = _round_up(C, 128)
    wp = jnp.zeros((Kp, Cp), jnp.bfloat16).at[:K, :C].set(w.astype(jnp.bfloat16))
    bp = jnp.zeros((1, Cp), jnp.float32).at[0, :C].set(b.astype(jnp.float32))
    return wp, bp


# -----------------------------------------------------------------------------
# Pallas kernel 1: fused multi-layer linear MLP (bias + ReLU between layers).
# All weights/biases stay resident in VMEM; only row tiles of x stream through.
# -----------------------------------------------------------------------------
def _fused_mlp_kernel(*refs, n_layers, relu_last):
    x_ref = refs[0]
    o_ref = refs[-1]
    h = x_ref[...]                                   # bf16 (tm, K_in)
    for l in range(n_layers):
        w = refs[1 + 2 * l][...]                     # bf16 (K, C)
        b = refs[2 + 2 * l][...]                     # f32  (1, C)
        h = jnp.dot(h, w, preferred_element_type=jnp.float32) + b
        if l < n_layers - 1 or relu_last:
            h = jnp.maximum(h, 0.0)
        if l < n_layers - 1:
            h = h.astype(jnp.bfloat16)
    o_ref[...] = h.astype(o_ref.dtype)


def fused_mlp(x, layers, *, relu_last=False, tm=512, out_dtype=jnp.float32):
    """y = MLP(x); x: (N, K), layers: [(W_pad bf16, b_pad f32), ...].

    Returns (round_up(N, tm_eff), C_out_pad) in `out_dtype`; caller slices.
    """
    N, K = x.shape
    K_in = layers[0][0].shape[0]
    C_out = layers[-1][0].shape[1]
    assert K <= K_in
    tm = _pick_tile(N, tm, 128)
    Np = _round_up(max(N, 1), tm)
    xp = jnp.zeros((Np, K_in), jnp.bfloat16).at[:N, :K].set(x.astype(jnp.bfloat16))

    in_specs = [pl.BlockSpec((tm, K_in), lambda i: (i, 0))]
    args = [xp]
    for (w, b) in layers:
        in_specs.append(pl.BlockSpec(w.shape, lambda i: (0, 0)))
        in_specs.append(pl.BlockSpec(b.shape, lambda i: (0, 0)))
        args.append(w)
        args.append(b)

    flops = 2 * Np * sum(int(w.shape[0]) * int(w.shape[1]) for w, _ in layers)
    bytes_accessed = int(xp.size) * 2 \
        + sum(int(w.size) * 2 + int(b.size) * 4 for w, b in layers) \
        + Np * C_out * jnp.dtype(out_dtype).itemsize

    return pl.pallas_call(
        functools.partial(_fused_mlp_kernel, n_layers=len(layers),
                          relu_last=relu_last),
        out_shape=jax.ShapeDtypeStruct((Np, C_out), out_dtype),
        grid_spec=pltpu.PrefetchScalarGridSpec(
            num_scalar_prefetch=0,
            grid=(Np // tm,),
            in_specs=in_specs,
            out_specs=pl.BlockSpec((tm, C_out), lambda i: (i, 0)),
        ),
        compiler_params=pltpu.CompilerParams(
            dimension_semantics=("parallel",),
        ),
        cost_estimate=pl.CostEstimate(flops=int(flops), transcendentals=0,
                                      bytes_accessed=int(bytes_accessed)),
    )(*args)


# -----------------------------------------------------------------------------
# Pallas kernel 2: sorted segment max (torch_scatter.scatter_max equivalent).
# grid = (voxel tiles [parallel], point blocks [arbitrary]).  Points are sorted
# by voxel id outside the kernel; scalar-prefetched per-voxel-tile block ranges
# let the kernel skip (DMA-elide + pl.when) point blocks that feed other tiles,
# and per-block voxel-id min/max bound the inner row loop.
# -----------------------------------------------------------------------------
def _seg_max_kernel(bs_ref, be_ref, lo_ref, hi_ref, idx_ref, feat_ref, o_ref):
    m = pl.program_id(0)
    n = pl.program_id(1)
    tm, C = o_ref.shape
    neg = jnp.float32(_NEG)

    @pl.when(n == 0)
    def _init():
        o_ref[...] = jnp.full((tm, C), neg, jnp.float32)

    nblk = be_ref[m] - bs_ref[m]

    @pl.when(n < nblk)
    def _accum():
        base = m * tm
        blk = bs_ref[m] + n
        # only voxel rows [r_lo, r_hi) of this tile can have points in this block
        r_lo = jnp.clip(lo_ref[blk] - base, 0, tm)
        r_hi = jnp.clip(jnp.minimum(hi_ref[blk], base + tm - 1) - base + 1, 0, tm)

        idx_t = idx_ref[0, :]                         # (tn,) int32, sorted
        feat = feat_ref[...]                          # (tn, C) bf16
        neg_fill = jnp.array(_NEG, dtype=feat.dtype)

        def row_body(r, carry):
            vox = base + r
            cand = jnp.max(jnp.where((idx_t == vox)[:, None], feat, neg_fill),
                           axis=0, keepdims=True).astype(jnp.float32)   # (1, C)
            o_ref[pl.ds(r, 1), :] = jnp.maximum(o_ref[pl.ds(r, 1), :], cand)
            return carry

        lax.fori_loop(r_lo, r_hi, row_body, 0)

    @pl.when(n == pl.num_programs(1) - 1)
    def _finalize():
        acc = o_ref[...]
        # voxels with no points -> 0 (matches previous behavior)
        o_ref[...] = jnp.where(acc <= _NEG_THRESH, 0.0, acc)


def pallas_scatter_max(idx, feat, num_slots, *, tm=256, tn=512):
    """Segment max of feat rows into num_slots voxel slots.

    idx: (N,) voxel id per point; feat: (Nf, C) with Nf >= N (extra rows are
    padding and ignored), C % 128 == 0.  Empty slots -> 0.  Output (num_slots, C) f32.
    """
    N = int(idx.shape[0])
    Nf, C = feat.shape
    assert C % 128 == 0 and N <= Nf
    tm = _pick_tile(num_slots, tm, 8)
    tn = _pick_tile(Nf, tn, 128)
    Np = _round_up(Nf, tn)
    Mp = _round_up(num_slots, tm)
    NB = Np // tn
    NM = Mp // tm

    idx_full = jnp.full((Np,), _SENTINEL, jnp.int32).at[:N].set(idx.astype(jnp.int32))
    feat_p = feat if Np == Nf else jnp.zeros((Np, C), feat.dtype).at[:Nf, :].set(feat)

    # Sort points by voxel id (XLA side); segments become contiguous, padded
    # rows (sentinel id) sort to the end and never match any voxel row.
    order = jnp.argsort(idx_full)
    sorted_idx = idx_full[order]
    sorted_feat = jnp.take(feat_p, order, axis=0)
    idx2d = sorted_idx.reshape(1, Np)

    # Per voxel tile: first/last point block feeding it.  Per point block: the
    # min/max voxel id it contains (bounds the in-kernel row loop).
    tile_lo = jnp.arange(NM, dtype=jnp.int32) * tm
    start = jnp.searchsorted(sorted_idx, tile_lo).astype(jnp.int32)
    end = jnp.searchsorted(sorted_idx, tile_lo + tm).astype(jnp.int32)
    blk_start = jnp.minimum(start // tn, NB - 1).astype(jnp.int32)
    blk_end = jnp.minimum((end + tn - 1) // tn, NB).astype(jnp.int32)
    blk_lo = sorted_idx[0::tn]                        # (NB,)
    blk_hi = sorted_idx[tn - 1::tn]                   # (NB,)

    def _blk(m, n, bs, be):
        b0 = bs[m]
        last = jnp.maximum(be[m] - b0, 1) - 1
        return b0 + jnp.minimum(n, last)              # clamped -> skipped steps re-use block

    fsize = jnp.dtype(feat.dtype).itemsize
    bytes_accessed = int(Np * C * fsize + Np * 4 + Mp * C * 4)
    flops = int(3 * Np * C + 4 * Mp * C)

    out = pl.pallas_call(
        _seg_max_kernel,
        out_shape=jax.ShapeDtypeStruct((Mp, C), jnp.float32),
        grid_spec=pltpu.PrefetchScalarGridSpec(
            num_scalar_prefetch=4,
            grid=(NM, NB),
            in_specs=[
                pl.BlockSpec((1, tn),
                             lambda m, n, bs, be, lo, hi: (0, _blk(m, n, bs, be))),
                pl.BlockSpec((tn, C),
                             lambda m, n, bs, be, lo, hi: (_blk(m, n, bs, be), 0)),
            ],
            out_specs=pl.BlockSpec((tm, C), lambda m, n, *_: (m, 0)),
        ),
        compiler_params=pltpu.CompilerParams(
            dimension_semantics=("parallel", "arbitrary"),
        ),
        cost_estimate=pl.CostEstimate(flops=flops, transcendentals=0,
                                      bytes_accessed=bytes_accessed),
    )(blk_start, blk_end, blk_lo, blk_hi, idx2d, sorted_feat)
    return out[:num_slots]


# -----------------------------------------------------------------------------
# Device-side unique voxel computation (replaces host-side np.unique).
# TODO(synk): uses XLA's jnp.unique (sort-based), not a Pallas kernel.
# -----------------------------------------------------------------------------
def _unique_voxels(cat_ind, sparse_shape, n_batch):
    X, Y, Z = sparse_shape
    # TODO(synk): switch to int64 keys for very large grids * batch sizes.
    assert n_batch * X * Y * Z < 2 ** 31
    keys = ((cat_ind[:, 0] * X + cat_ind[:, 1]) * Y + cat_ind[:, 2]) * Z + cat_ind[:, 3]
    fill = n_batch * X * Y * Z                        # > any valid key
    unq, inv = jnp.unique(keys, size=keys.shape[0], fill_value=fill,
                          return_inverse=True)
    inv = inv.reshape(-1).astype(jnp.int32)
    valid = unq < fill
    b = unq // (X * Y * Z)
    rem = unq % (X * Y * Z)
    cx = rem // (Y * Z)
    rem = rem % (Y * Z)
    cy = rem // Z
    cz = rem % Z
    coords = jnp.stack([b, cx, cy, cz], axis=1).astype(jnp.int32)
    # padded (non-existent) voxel slots -> huge coord so the dense scatter drops them
    coords = jnp.where(valid[:, None], coords, jnp.int32(1_000_000))
    return coords, inv


# -----------------------------------------------------------------------------
# CylinderAsym equivalent
# -----------------------------------------------------------------------------
class CylinderAsymPallas:
    def __init__(self, params, sparse_shape, pool_dim, init_size):
        self.sparse_shape = tuple(sparse_shape)
        self.out_channels = pool_dim            # cylin_model.pool_dim
        self.init_size = init_size              # segmentator_spconv.init_size
        self.n_class = params["Ws2"].shape[1]
        # pre-pad all weights/biases once; first PPmodel layer keeps true K
        self.pp_layers = [_pad_wb(params["W1"], params["b1"], pad_k=False),
                          _pad_wb(params["W2"], params["b2"]),
                          _pad_wb(params["W3"], params["b3"])]
        self.seg_layers = [_pad_wb(params["Ws1"], params["bs1"]),
                           _pad_wb(params["Ws2"], params["bs2"])]

    # ---- cylin_model (cylinder_fea) ----
    def cylinder_3d_generator(self, train_pt_fea_ten, train_vox_ten):
        cat_pt_fea = jnp.concatenate(
            [f.astype(jnp.float32) for f in train_pt_fea_ten], axis=0)
        cat_ind = jnp.concatenate(
            [jnp.concatenate([jnp.full((v.shape[0], 1), b, dtype=jnp.int32),
                              v.astype(jnp.int32)], axis=1)
             for b, v in enumerate(train_vox_ten)], axis=0)
        n_batch = len(train_vox_ten)

        coords, indices = _unique_voxels(cat_ind, self.sparse_shape, n_batch)
        # TODO(synk): the original random point shuffle is omitted (max pooling
        # is permutation invariant, so the forward value is unchanged).

        # PPmodel point MLP: single fused Pallas kernel (3 layers, bf16 MXU).
        # Output is bf16 to halve the HBM traffic into the pooling kernel.
        h = fused_mlp(cat_pt_fea, self.pp_layers, relu_last=False,
                      out_dtype=jnp.bfloat16)

        # sorted-segment scatter-max pooling into unique voxel slots
        num_slots = cat_ind.shape[0]
        features_3d = pallas_scatter_max(indices, h, num_slots)   # (M, 128) f32
        return coords, indices, features_3d

    # ---- segmentator_spconv (Asym_3d_spconv, simplified) ----
    def cylinder_3d_spconv_seg(self, features_3d, coords, batch_size):
        M = features_3d.shape[0]
        # per-voxel 1x1x1 "conv" head: single fused Pallas kernel (2 layers)
        logits_p = fused_mlp(features_3d, self.seg_layers, relu_last=False,
                             out_dtype=jnp.float32)
        logits = logits_p[:M, :self.n_class]

        X, Y, Z = self.sparse_shape
        # Scatter straight into NCDHW (spconv .dense() layout): writes only
        # M*C elements, no full-tensor transpose afterwards.
        # TODO(synk): densification stays an XLA scatter (data-dependent indices).
        dense = jnp.zeros((batch_size, self.n_class, X, Y, Z), jnp.float32)
        dense = dense.at[coords[:, 0], :, coords[:, 1], coords[:, 2],
                         coords[:, 3]].set(logits, mode="drop")
        return dense                                              # (B, C, X, Y, Z)

    # ---- CylinderAsym.forward ----
    def forward(self, train_pt_fea_ten, train_vox_ten, batch_size,
                val_grid=None, voting_num=4, use_tta=False):
        coords, indices, features_3d = self.cylinder_3d_generator(
            train_pt_fea_ten, train_vox_ten)
        if use_tta:
            batch_size *= voting_num
        spatial_features = self.cylinder_3d_spconv_seg(
            features_3d, coords, batch_size)
        if use_tta:
            fused = spatial_features[0, :, val_grid[0][:, 0],
                                     val_grid[0][:, 1], val_grid[0][:, 2]]
            for idx in range(1, voting_num, 1):
                fused = fused + spatial_features[idx, :, val_grid[idx][:, 0],
                                                 val_grid[idx][:, 1],
                                                 val_grid[idx][:, 2]]
            return fused
        else:
            return (spatial_features, indices)


# -----------------------------------------------------------------------------
if __name__ == "__main__":
    key = jax.random.PRNGKey(0)
    batch_size = 2
    n_pts = 128            # points per batch element
    in_fea = 16            # input point feature dim
    hidden = 64
    pool_dim = 32          # cylin_model.pool_dim
    init_size = 32         # segmentator_spconv.init_size
    n_class = 8
    sparse_shape = (8, 8, 4)

    keys = jax.random.split(key, 16)

    def winit(k, shape, scale=0.1):
        return scale * jax.random.normal(k, shape, dtype=jnp.float32)

    params = dict(
        W1=winit(keys[0], (in_fea, hidden)), b1=winit(keys[1], (hidden,)),
        W2=winit(keys[2], (hidden, hidden)), b2=winit(keys[3], (hidden,)),
        W3=winit(keys[4], (hidden, pool_dim)), b3=winit(keys[5], (pool_dim,)),
        Ws1=winit(keys[6], (pool_dim, init_size)), bs1=winit(keys[7], (init_size,)),
        Ws2=winit(keys[8], (init_size, n_class)), bs2=winit(keys[9], (n_class,)),
    )

    model = CylinderAsymPallas(params, sparse_shape, pool_dim, init_size)

    train_pt_fea_ten, train_vox_ten = [], []
    for b in range(batch_size):
        kf, kx, ky, kz = jax.random.split(keys[10 + b], 4)
        train_pt_fea_ten.append(
            jax.random.normal(kf, (n_pts, in_fea), dtype=jnp.float32))
        vx = jax.random.randint(kx, (n_pts, 1), 0, sparse_shape[0])
        vy = jax.random.randint(ky, (n_pts, 1), 0, sparse_shape[1])
        vz = jax.random.randint(kz, (n_pts, 1), 0, sparse_shape[2])
        train_vox_ten.append(
            jnp.concatenate([vx, vy, vz], axis=1).astype(jnp.int32))

    spatial_features, indices = model.forward(
        train_pt_fea_ten, train_vox_ten, batch_size)
    jax.block_until_ready(spatial_features)
    jax.block_until_ready(indices)

    assert spatial_features.shape == (batch_size, n_class) + sparse_shape
    assert indices.shape == (batch_size * n_pts,)
    assert bool(jnp.all(jnp.isfinite(spatial_features)))
    print("KERNEL_OK")
</pallas_src>

<mosaic_0001>
module attributes {stable_mosaic.version = 11 : i64} {
  func.func @_fused_mlp_kernel(%arg0: i32, %arg1: memref<128x16xbf16, #tpu.memory_space<vmem>>, %arg2: memref<16x128xbf16, #tpu.memory_space<vmem>>, %arg3: memref<1x128xf32, #tpu.memory_space<vmem>>, %arg4: memref<128x128xbf16, #tpu.memory_space<vmem>>, %arg5: memref<1x128xf32, #tpu.memory_space<vmem>>, %arg6: memref<128x128xbf16, #tpu.memory_space<vmem>>, %arg7: memref<1x128xf32, #tpu.memory_space<vmem>>, %arg8: memref<128x128xbf16, #tpu.memory_space<vmem>>) attributes {dimension_semantics = [#tpu.dimension_semantics<parallel>], iteration_bounds = array<i64: 2>, scalar_prefetch = 0 : i64, scratch_operands = 0 : i64, tpu.core_type = #tpu.core_type<tc>, window_params = [{transform_indices = @transform_0, window_bounds = array<i64: 128, 16>}, {pipeline_mode = #tpu.pipeline_mode<synchronous>, transform_indices = @transform_1, window_bounds = array<i64: 16, 128>}, {pipeline_mode = #tpu.pipeline_mode<synchronous>, transform_indices = @transform_2, window_bounds = array<i64: 1, 128>}, {pipeline_mode = #tpu.pipeline_mode<synchronous>, transform_indices = @transform_3, window_bounds = array<i64: 128, 128>}, {pipeline_mode = #tpu.pipeline_mode<synchronous>, transform_indices = @transform_4, window_bounds = array<i64: 1, 128>}, {pipeline_mode = #tpu.pipeline_mode<synchronous>, transform_indices = @transform_5, window_bounds = array<i64: 128, 128>}, {pipeline_mode = #tpu.pipeline_mode<synchronous>, transform_indices = @transform_6, window_bounds = array<i64: 1, 128>}, {transform_indices = @transform_7, window_bounds = array<i64: 128, 128>}]} {
    %c0 = arith.constant 0 : index
    %c0_0 = arith.constant 0 : index
    %0 = vector.load %arg1[%c0, %c0_0] : memref<128x16xbf16, #tpu.memory_space<vmem>>, vector<128x16xbf16>
    %c0_1 = arith.constant 0 : index
    %c0_2 = arith.constant 0 : index
    %1 = vector.load %arg2[%c0_1, %c0_2] : memref<16x128xbf16, #tpu.memory_space<vmem>>, vector<16x128xbf16>
    %c0_3 = arith.constant 0 : index
    %c0_4 = arith.constant 0 : index
    %2 = vector.load %arg3[%c0_3, %c0_4] : memref<1x128xf32, #tpu.memory_space<vmem>>, vector<1x128xf32>
    %cst = arith.constant dense<0.000000e+00> : vector<128x128xf32>
    %3 = tpu.matmul %0, %1, %cst {dimension_numbers = #tpu.dot_dimension_numbers<[1], [0], [0], [1], [0, 0, 1, 1], [], []>} : vector<128x16xbf16>, vector<16x128xbf16>, vector<128x128xf32> -> vector<128x128xf32>
    %4 = vector.broadcast %2 : vector<1x128xf32> to vector<128x128xf32>
    %5 = arith.addf %3, %4 : vector<128x128xf32>
    %cst_5 = arith.constant 0.000000e+00 : f32
    %6 = vector.broadcast %cst_5 : f32 to vector<128x128xf32>
    %7 = arith.maximumf %5, %6 : vector<128x128xf32>
    %8 = arith.truncf %7 : vector<128x128xf32> to vector<128x128xbf16>
    %c0_6 = arith.constant 0 : index
    %c0_7 = arith.constant 0 : index
    %9 = vector.load %arg4[%c0_6, %c0_7] : memref<128x128xbf16, #tpu.memory_space<vmem>>, vector<128x128xbf16>
    %c0_8 = arith.constant 0 : index
    %c0_9 = arith.constant 0 : index
    %10 = vector.load %arg5[%c0_8, %c0_9] : memref<1x128xf32, #tpu.memory_space<vmem>>, vector<1x128xf32>
    %cst_10 = arith.constant dense<0.000000e+00> : vector<128x128xf32>
    %11 = tpu.matmul %8, %9, %cst_10 {dimension_numbers = #tpu.dot_dimension_numbers<[1], [0], [0], [1], [0, 0, 1, 1], [], []>} : vector<128x128xbf16>, vector<128x128xbf16>, vector<128x128xf32> -> vector<128x128xf32>
    %12 = vector.broadcast %10 : vector<1x128xf32> to vector<128x128xf32>
    %13 = arith.addf %11, %12 : vector<128x128xf32>
    %cst_11 = arith.constant 0.000000e+00 : f32
    %14 = vector.broadcast %cst_11 : f32 to vector<128x128xf32>
    %15 = arith.maximumf %13, %14 : vector<128x128xf32>
    %16 = arith.truncf %15 : vector<128x128xf32> to vector<128x128xbf16>
    %c0_12 = arith.constant 0 : index
    %c0_13 = arith.constant 0 : index
    %17 = vector.load %arg6[%c0_12, %c0_13] : memref<128x128xbf16, #tpu.memory_space<vmem>>, vector<128x128xbf16>
    %c0_14 = arith.constant 0 : index
    %c0_15 = arith.constant 0 : index
    %18 = vector.load %arg7[%c0_14, %c0_15] : memref<1x128xf32, #tpu.memory_space<vmem>>, vector<1x128xf32>
    %cst_16 = arith.constant dense<0.000000e+00> : vector<128x128xf32>
    %19 = tpu.matmul %16, %17, %cst_16 {dimension_numbers = #tpu.dot_dimension_numbers<[1], [0], [0], [1], [0, 0, 1, 1], [], []>} : vector<128x128xbf16>, vector<128x128xbf16>, vector<128x128xf32> -> vector<128x128xf32>
    %20 = vector.broadcast %18 : vector<1x128xf32> to vector<128x128xf32>
    %21 = arith.addf %19, %20 : vector<128x128xf32>
    %22 = arith.truncf %21 : vector<128x128xf32> to vector<128x128xbf16>
    %c0_17 = arith.constant 0 : index
    %c0_18 = arith.constant 0 : index
    %23 = vector.load %arg8[%c0_17, %c0_18] : memref<128x128xbf16, #tpu.memory_space<vmem>>, vector<128x128xbf16>
    tpu.vector_store %arg8[%c0_17, %c0_18], %22 {strides = array<i32>} : memref<128x128xbf16, #tpu.memory_space<vmem>>, vector<128x128xbf16>,
    return
  }
  func.func @transform_0(%arg0: i32) -> (i32, i32) {
    %c0_i32 = arith.constant 0 : i32
    %c0_i32_0 = arith.constant 0 : i32
    return %arg0, %c0_i32 : i32, i32
  }
  func.func @transform_1(%arg0: i32) -> (i32, i32) {
    %c0_i32 = arith.constant 0 : i32
    %c0_i32_0 = arith.constant 0 : i32
    %c0_i32_1 = arith.constant 0 : i32
    return %c0_i32, %c0_i32_0 : i32, i32
  }
  func.func @transform_2(%arg0: i32) -> (i32, i32) {
    %c0_i32 = arith.constant 0 : i32
    %c0_i32_0 = arith.constant 0 : i32
    %c0_i32_1 = arith.constant 0 : i32
    return %c0_i32, %c0_i32_0 : i32, i32
  }
  func.func @transform_3(%arg0: i32) -> (i32, i32) {
    %c0_i32 = arith.constant 0 : i32
    %c0_i32_0 = arith.constant 0 : i32
    %c0_i32_1 = arith.constant 0 : i32
    return %c0_i32, %c0_i32_0 : i32, i32
  }
  func.func @transform_4(%arg0: i32) -> (i32, i32) {
    %c0_i32 = arith.constant 0 : i32
    %c0_i32_0 = arith.constant 0 : i32
    %c0_i32_1 = arith.constant 0 : i32
    return %c0_i32, %c0_i32_0 : i32, i32
  }
  func.func @transform_5(%arg0: i32) -> (i32, i32) {
    %c0_i32 = arith.constant 0 : i32
    %c0_i32_0 = arith.constant 0 : i32
    %c0_i32_1 = arith.constant 0 : i32
    return %c0_i32, %c0_i32_0 : i32, i32
  }
  func.func @transform_6(%arg0: i32) -> (i32, i32) {
    %c0_i32 = arith.constant 0 : i32
    %c0_i32_0 = arith.constant 0 : i32
    %c0_i32_1 = arith.constant 0 : i32
    return %c0_i32, %c0_i32_0 : i32, i32
  }
  func.func @transform_7(%arg0: i32) -> (i32, i32) {
    %c0_i32 = arith.constant 0 : i32
    %c0_i32_0 = arith.constant 0 : i32
    return %arg0, %c0_i32 : i32, i32
  }
}

</mosaic_0001>

<bundles_post_ra>
// kernel: tpu_custom_call.1
= control target key start
LH: loop header
LB: loop body
LE: loop exit
PB: predicated region body
PF: predicated region fallthrough
CT: control target
= control target key end

     0   :  { %12 = vsyncpa [#allocation3], 0  ;;  %s1623_s0 = inlined_call_operand.vmem [shape: bf16[256,16], index: 0, kind: input, shape index: {}]   ;;  %s1624_s1 = inlined_call_operand.vmem [shape: bf16[16,128], index: 1, kind: input, shape index: {}]   ;;  %s1625_s2 = inlined_call_operand.vmem [shape: f32[1,128], index: 2, kind: input, shape index: {}]   ;;  %s1626_s3 = inlined_call_operand.vmem [shape: bf16[128,128], index: 3, kind: input, shape index: {}]   ;;  %s1627_s4 = inlined_call_operand.vmem [shape: f32[1,128], index: 4, kind: input, shape index: {}]   ;;  %s1628_s5 = inlined_call_operand.vmem [shape: bf16[128,128], index: 5, kind: input, shape index: {}]   ;;  %s1629_s6 = inlined_call_operand.vmem [shape: f32[1,128], index: 6, kind: input, shape index: {}]   ;;  %s1630_s7 = inlined_call_operand.hbm [shape: bf16[256,128], index: 7, kind: output, shape index: {}]  }
   0x1   :  { %14 = vsyncpa [#allocation3 + $0x1], 0  ;;  %s1438_s24 = smov 0   ;;  %s1440_s25 = smov 0  }
   0x2   :  { %s1442_s26 = smov 0   ;;  %s1444_s27 = smov 0  }
   0x3 LB: > { %s1459_s28 = sadd.s32 4294967295, %s1393_s27   ;;  %s1014_s29 = sadd.s32 4294967294, %s1393_s27   ;;  %s1393_s27 = sphi %s1444_s27, %s1636_s27   ;;  %s1389_s26 = sphi %s1442_s26, %s1635_s26   ;;  %s1385_s25 = sphi %s1440_s25, %s1634_s25   ;;  %s1381_s24 = sphi %s1438_s24, %s1633_s24  }
   0x4   : > { %s1463_s30 = sadd.s32 1, %s1393_s27   ;;  %s179_s8 = sadd.s32 1, %s1389_s26 }
   0x5   : > { %s176_s9 = ssub.s32 %s1393_s27, %s1463_s30  ;;  %p189_p0 = scmp.ne.s32.totalorder %s1389_s26, %s1385_s25 }
   0x6   : > { %p177_p1 = scmp.eq.s32.totalorder %s176_s9, 0  ;;  %p190_p2 = scmp.eq.s32.totalorder %s1459_s28, 1 }
   0x7   : > { %p195_p3 = scmp.ne.s32.totalorder %s1385_s25, %s1381_s24  ;;  %p196_p4 = scmp.eq.s32.totalorder %s1014_s29, 1 }
   0x8   : > { %s1474_s10 = scalar_select %p177_p1, %s1389_s26, %s179_s8  }
   0x9   : > { %p1476_p5 = por %p190_p2, %p189_p0  ;;  %p1480_p6 = por %p196_p4, %p195_p3 }
   0xa   : > { %p1017_p7 = scmp.ge.s32.totalorder %s1393_s27, 1  ;;  %p241_p8 = scmp.lt.s32.totalorder %s1393_s27, 3 }
   0xc   : > { %p242_p9 = pnand %p1017_p7, %p241_p8 }
   0xd   : > { %v1306_v0 = vld [vmem:[%s1624_s1] sm:$0xff] (!%p242_p9)   ;;  %s1019_s15 = sshll.u32 (!%p242_p9), %s1459_s28, 4  ;;  %v1316_v2 = vld [vmem:[%s1626_s3 + $0x8] sm:$0xff] (!%p242_p9)   ;;  %vm352_vm0 = vcmask (!%p242_p9), 130048   ;;  %v1317_v3 = vld [vmem:[%s1626_s3 + $0x10] sm:$0xff] (!%p242_p9)   ;;  %s270_s14 = sand.u32 (!%p242_p9), 1, %s1385_s25  }
   0xe   : > { %245 = sbr.rel (%p242_p9) target bundleno = 728 (0x2d8), region = 48  ;;  %p274_p10 = scmp.lt.s32.totalorder (!%p242_p9), %s1019_s15, 31  ;;  %1183 = vmatprep.subr.bf16.mxu0 (!%p242_p9), %v1306_v0  ;;  %v1315_v1 = vld [vmem:[%s1626_s3] sm:$0xff] (!%p242_p9)   ;;  %v1318_v7 = vld [vmem:[%s1626_s3 + $0x18] sm:$0xff] (!%p242_p9)   ;;  %v1320_v11 = vld [vmem:[%s1626_s3 + $0x28] sm:$0xff] (!%p242_p9)  }
   0xf   : > { %1184 = vmatpush3.bf16.msra.mxu0 (!%p242_p9), %v1306_v0  ;;  %1201 = vmatprep.subr.bf16.mxu1 (!%p242_p9), %v1315_v1  ;;  %v1319_v8 = vld [vmem:[%s1626_s3 + $0x20] sm:$0xff] (!%p242_p9)   ;;  %v1321_v15 = vld [vmem:[%s1626_s3 + $0x30] sm:$0xff] (!%p242_p9)   ;;  %v1322_v16 = vld [vmem:[%s1626_s3 + $0x38] sm:$0xff] (!%p242_p9)   ;;  %s1018_s17 = sshll.u32 (!%p242_p9), %s270_s14, 6  ;;  %s1094_s19 = sshll.u32 (!%p242_p9), %s1459_s28, 10 }
  0x10   : > { %1202 = vmatpush3.bf16.msra.mxu1 (!%p242_p9), %v1315_v1  ;;  %v1323_v17 = vld [vmem:[%s1628_s5] sm:$0xff] (!%p242_p9)   ;;  %v1324_v18 = vld [vmem:[%s1628_s5 + $0x8] sm:$0xff] (!%p242_p9)   ;;  %v1325_v19 = vld [vmem:[%s1628_s5 + $0x10] sm:$0xff] (!%p242_p9)   ;;  %s1561_s18 = scalar_lea.vmem (!%p242_p9), [#allocation2], %s1018_s17  ;;  %s1574_s29 = scalar_lea.hbm (!%p242_p9), %s1630_s7, %s1094_s19 }
  0x11   : > { %1203 = vmatprep.subr.bf16.mxu1 (!%p242_p9), %v1316_v2  ;;  %1233 = vmatprep.subr.bf16.mxu0 (!%p242_p9), %v1323_v17  ;;  %v1326_v20 = vld [vmem:[%s1628_s5 + $0x18] sm:$0xff] (!%p242_p9)   ;;  %v1327_v21 = vld [vmem:[%s1628_s5 + $0x20] sm:$0xff] (!%p242_p9)   ;;  %v1328_v22 = vld [vmem:[%s1628_s5 + $0x28] sm:$0xff] (!%p242_p9)   ;;  %s1582_s28 = scalar_lea.sflag (!%p242_p9), [#allocation3], %s270_s14 }
  0x12   : > { %v1021_v23 = vld [vmem:[%s1625_s2] ss:$0 sm:$0xff] (!%p242_p9) }
  0x14   : > { %1204 = vmatpush3.bf16.msra.mxu1 (!%p242_p9), %v1316_v2 }
  0x15   : > { %s1638_s15 = smov (!%p274_p10, %s1019_s15), 31  ;;  %1205 = vmatprep.subr.bf16.mxu1 %v1317_v3 }
  0x16   : > { %s1020_s20 = sshll.u32 %s1638_s15, 2 }
  0x17   : > { %s277_s23 = scalar_lea.vmem %s1623_s0, %s1020_s20  ;;  %s952_s20 = sshll.u32 %s1561_s18, 4  ;;  %s1576_s20 = int_to_ptr.vmem [resolvable:$true] %s952_s20 }
  0x18   : > { %v1307_v4 = vld [vmem:[%s277_s23] sm:$0xff]   ;;  %v1308_v5 = vld [vmem:[%s277_s23 + $0x8] sm:$0xff]   ;;  %v1309_v6 = vld [vmem:[%s277_s23 + $0x10] sm:$0xff]   ;;  %1206 = vmatpush3.bf16.msra.mxu1 %v1317_v3  ;;  %s1331_s8 = scalar_lea.vmem %s1576_s20, 1024 }
  0x19   : > { %1185 = vmatprep.mubr.msk.bf16.mxu0 %vm352_vm0, %v1307_v4  ;;  %v1310_v9 = vld [vmem:[%s277_s23 + $0x18] sm:$0xff]   ;;  %1207 = vmatprep.subr.bf16.mxu1 %v1318_v7  ;;  %v1311_v10 = vld [vmem:[%s277_s23 + $0x20] sm:$0xff]   ;;  %v1312_v12 = vld [vmem:[%s277_s23 + $0x28] sm:$0xff]   ;;  %p1332_p11 = scmp.ne.s32.totalorder %s1576_s20, %s1331_s8 }
  0x1a   : > { %1186 = vmatmul.mubr.msk.bf16.vlgmr.msra.gmra.mrb[0].mxu0 %vm352_vm0, %v1308_v5  ;;  %v1313_v13 = vld [vmem:[%s277_s23 + $0x30] sm:$0xff]   ;;  %v1314_v14 = vld [vmem:[%s277_s23 + $0x38] sm:$0xff]   ;;  %s1395_s23 = smov [#allocation2]  }
  0x1b   : > { %1189 = vmatprep.mubr.msk.bf16.mxu0 %vm352_vm0, %v1309_v6  ;;  %1234 = vmatpush3.bf16.msra.mxu0 %v1323_v17  ;;  %v1330_v17 = vld [vmem:[%s1628_s5 + $0x38] sm:$0xff]   ;;  %p1333_p12 = pnand %p1332_p11, %p1476_p5  ;;  %s1335_s9 = sshll.u32 %s1395_s23, 4  ;;  %s1336_s9 = int_to_ptr.vmem [resolvable:$false] %s1335_s9 }
  0x1c   : > { %1208 = vmatpush3.bf16.msra.mxu1 %v1318_v7  ;;  %1235 = vmatprep.subr.bf16.mxu0 %v1324_v18  ;;  %s1337_s13 = scalar_lea.vmem %s1336_s9, 2048  ;;  %p1338_p0 = scmp.lt.s32.totalorder %s1576_s20, %s1336_s9 }
  0x1d   : > { %1209 = vmatprep.subr.bf16.mxu1 %v1319_v8  ;;  %p1334_p13 = pneg %p1333_p12  ;;  %p1339_p1 = scmp.lt.s32.totalorder %s1337_s13, %s1331_s8 }
  0x1f   : > { %1236 = vmatpush3.bf16.msra.mxu0 %v1324_v18  ;;  %v1039_v18 = vld [vmem:[%s1627_s4] ss:$0 sm:$0xff]  ;;  %p1340_p2 = por %p1339_p1, %p1338_p0 }
  0x20   : > { %1210 = vmatpush3.bf16.msra.mxu1 %v1319_v8  ;;  %1237 = vmatprep.subr.bf16.mxu0 %v1325_v19 }
  0x21   : > { %1211 = vmatprep.subr.bf16.mxu1 %v1320_v11  ;;  %p1341_p3 = pnand %p1340_p2, %p1334_p13 }
  0x22   : > { %1190 = vmatmul.mubr.msk.bf16.gmra.mrb[4].mxu0 %vm352_vm0, %v1310_v9 }
  0x23   : > { %1193 = vmatprep.mubr.msk.bf16.mxu0 %vm352_vm0, %v1311_v10  ;;  %1238 = vmatpush3.bf16.msra.mxu0 %v1325_v19 }
  0x24   : > { %1212 = vmatpush3.bf16.msra.mxu1 %v1320_v11  ;;  %1239 = vmatprep.subr.bf16.mxu0 %v1326_v20 }
  0x25   : > { %1213 = vmatprep.subr.bf16.mxu1 %v1321_v15 }
  0x27   : > { %1240 = vmatpush3.bf16.msra.mxu0 %v1326_v20 }
  0x28   : > { %1214 = vmatpush3.bf16.msra.mxu1 %v1321_v15  ;;  %1241 = vmatprep.subr.bf16.mxu0 %v1327_v21 }
  0x29   : > { %1215 = vmatprep.subr.bf16.mxu1 %v1322_v16 }
  0x2a   : > { %1194 = vmatmul.mubr.msk.bf16.gmra.mrb[8].mxu0 %vm352_vm0, %v1312_v12 }
  0x2b   : > { %1197 = vmatprep.mubr.msk.bf16.mxu0 %vm352_vm0, %v1313_v13  ;;  %1242 = vmatpush3.bf16.msra.mxu0 %v1327_v21 }
  0x2c   : > { %1216 = vmatpush3.bf16.msra.mxu1 %v1322_v16  ;;  %1243 = vmatprep.subr.bf16.mxu0 %v1328_v22  ;;  %v1329_v16 = vld [vmem:[%s1628_s5 + $0x30] sm:$0xff]  }
  0x2f   : > { %1244 = vmatpush3.bf16.msra.mxu0 %v1328_v22 }
  0x30   : > { %1245 = vmatprep.subr.bf16.mxu0 %v1329_v16 }
  0x32   : > { %1198 = vmatmul.mubr.msk.bf16.gmra.mrb[12].mxu0 %vm352_vm0, %v1314_v14 }
  0x33   : > { %1246 = vmatpush3.bf16.msra.mxu0 %v1329_v16 }
  0x34   : > { %1247 = vmatprep.subr.bf16.mxu0 %v1330_v17 }
  0x37   : > { %1248 = vmatpush3.bf16.msra.mxu0 %v1330_v17 }
  0xed   : > { %v1187_v24 = vpop.f32.mrb[0].mxu0 }
  0xee   : > { %v420_v25 = vadd.f32 %v1187_v24, %v1021_v23  ;;  %v411_v26 = vpop.f32.mrb[1].mxu0 }
  0xef   : > { %v412_v27 = vadd.f32 %v1021_v23, %v411_v26  ;;  %v1188_v28 = vpop.f32.mrb[2].mxu0 }
  0xf0   : > { %v423_v29 = vadd.f32 %v1188_v28, %v1021_v23  ;;  %v414_v30 = vpop.f32.mrb[3].mxu0  ;;  %v476_v32 = vmax.f32 %v420_v25, 0.0 }
  0xf1   : > { %v415_v31 = vadd.f32 %v1021_v23, %v414_v30  ;;  %v474_v34 = vmax.f32 %v412_v27, 0.0 }
  0xf2   : > { %v477_v33 = vmax.f32 %v423_v29, 0.0 }
  0xf3   : > { %v475_v35 = vmax.f32 %v415_v31, 0.0 }
  0xf4   : > { %v491_v36 = vpack.c.bf16 %v477_v33, %v476_v32 }
  0xf5   : > { %v1191_v37 = vpop.f32.mrb[4].mxu0  ;;  %v490_v38 = vpack.c.bf16 %v475_v35, %v474_v34 }
  0xf6   : > { %v436_v39 = vadd.f32 %v1191_v37, %v1021_v23  ;;  %v427_v40 = vpop.f32.mrb[5].mxu0 }
  0xf7   : > { %v428_v41 = vadd.f32 %v1021_v23, %v427_v40  ;;  %v1192_v42 = vpop.f32.mrb[6].mxu0  ;;  %1217 = vmatprep.mubr.bf16.mxu1 %v490_v38 }
  0xf8   : > { %v439_v43 = vadd.f32 %v1192_v42, %v1021_v23  ;;  %v430_v44 = vpop.f32.mrb[7].mxu0  ;;  %1218 = vmatmul.mubr.bf16.vlgmr.msra.gmra.mrb[0].mxu1 %v491_v36  ;;  %v480_v46 = vmax.f32 %v436_v39, 0.0 }
  0xf9   : > { %v431_v45 = vadd.f32 %v1021_v23, %v430_v44  ;;  %v478_v48 = vmax.f32 %v428_v41, 0.0 }
  0xfa   : > { %v481_v47 = vmax.f32 %v439_v43, 0.0 }
  0xfb   : > { %v479_v49 = vmax.f32 %v431_v45, 0.0 }
  0xfc   : > { %v493_v50 = vpack.c.bf16 %v481_v47, %v480_v46 }
  0xfd   : > { %v492_v51 = vpack.c.bf16 %v479_v49, %v478_v48  ;;  %v1195_v52 = vpop.f32.mrb[8].mxu0 }
  0xfe   : > { %v452_v53 = vadd.f32 %v1195_v52, %v1021_v23  ;;  %v443_v54 = vpop.f32.mrb[9].mxu0 }
  0xff   : > { %v444_v55 = vadd.f32 %v1021_v23, %v443_v54  ;;  %v1196_v56 = vpop.f32.mrb[10].mxu0  ;;  %1221 = vmatprep.mubr.bf16.mxu1 %v492_v51 }
 0x100   : > { %v455_v57 = vadd.f32 %v1196_v56, %v1021_v23  ;;  %v446_v58 = vpop.f32.mrb[11].mxu0  ;;  %1222 = vmatmul.mubr.bf16.gmra.mrb[4].mxu1 %v493_v50  ;;  %v484_v60 = vmax.f32 %v452_v53, 0.0 }
 0x101   : > { %v447_v59 = vadd.f32 %v1021_v23, %v446_v58  ;;  %v482_v62 = vmax.f32 %v444_v55, 0.0 }
 0x102   : > { %v485_v61 = vmax.f32 %v455_v57, 0.0 }
 0x103   : > { %v483_v63 = vmax.f32 %v447_v59, 0.0 }
 0x104   : > { %v495_v0 = vpack.c.bf16 %v485_v61, %v484_v60 }
 0x105   : > { %v494_v1 = vpack.c.bf16 %v483_v63, %v482_v62  ;;  %v1199_v2 = vpop.f32.mrb[12].mxu0 }
 0x106   : > { %v468_v3 = vadd.f32 %v1199_v2, %v1021_v23  ;;  %v459_v4 = vpop.f32.mrb[13].mxu0 }
 0x107   : > { %v460_v5 = vadd.f32 %v1021_v23, %v459_v4  ;;  %v1200_v6 = vpop.f32.mrb[14].mxu0  ;;  %1225 = vmatprep.mubr.bf16.mxu1 %v494_v1 }
 0x108   : > { %v471_v7 = vadd.f32 %v1200_v6, %v1021_v23  ;;  %v462_v8 = vpop.f32.mrb[15].mxu0  ;;  %1226 = vmatmul.mubr.bf16.gmra.mrb[8].mxu1 %v495_v0  ;;  %v488_v10 = vmax.f32 %v468_v3, 0.0 }
 0x109   : > { %v463_v9 = vadd.f32 %v1021_v23, %v462_v8  ;;  %v486_v12 = vmax.f32 %v460_v5, 0.0 }
 0x10a   : > { %v489_v11 = vmax.f32 %v471_v7, 0.0 }
 0x10b   : > { %v487_v13 = vmax.f32 %v463_v9, 0.0 }
 0x10c   : > { %v497_v14 = vpack.c.bf16 %v489_v11, %v488_v10 }
 0x10d   : > { %v496_v15 = vpack.c.bf16 %v487_v13, %v486_v12  ;;  %v1048_v12 = vld [vmem:[%s1629_s6] ss:$0 sm:$0xff] }
 0x10f   : > { %1229 = vmatprep.mubr.bf16.mxu1 %v496_v15 }
 0x110   : > { %1230 = vmatmul.mubr.bf16.gmra.mrb[12].mxu1 %v497_v14 }
 0x1cb   : > { %v1219_v19 = vpop.f32.mrb[0].mxu1 }
 0x1cc   : > { %v612_v20 = vadd.f32 %v1219_v19, %v1039_v18  ;;  %v603_v21 = vpop.f32.mrb[1].mxu1 }
 0x1cd   : > { %v604_v22 = vadd.f32 %v1039_v18, %v603_v21  ;;  %v1220_v23 = vpop.f32.mrb[2].mxu1 }
 0x1ce   : > { %v615_v24 = vadd.f32 %v1220_v23, %v1039_v18  ;;  %v606_v25 = vpop.f32.mrb[3].mxu1  ;;  %v668_v27 = vmax.f32 %v612_v20, 0.0 }
 0x1cf   : > { %v607_v26 = vadd.f32 %v1039_v18, %v606_v25  ;;  %v666_v29 = vmax.f32 %v604_v22, 0.0 }
 0x1d0   : > { %v669_v28 = vmax.f32 %v615_v24, 0.0 }
 0x1d1   : > { %v667_v30 = vmax.f32 %v607_v26, 0.0 }
 0x1d2   : > { %v683_v31 = vpack.c.bf16 %v669_v28, %v668_v27 }
 0x1d3   : > { %v682_v32 = vpack.c.bf16 %v667_v30, %v666_v29  ;;  %v1223_v33 = vpop.f32.mrb[4].mxu1 }
 0x1d4   : > { %v628_v34 = vadd.f32 %v1223_v33, %v1039_v18  ;;  %v619_v35 = vpop.f32.mrb[5].mxu1 }
 0x1d5   : > { %v620_v36 = vadd.f32 %v1039_v18, %v619_v35  ;;  %v1224_v37 = vpop.f32.mrb[6].mxu1  ;;  %1249 = vmatprep.mubr.bf16.mxu0 %v682_v32 }
 0x1d6   : > { %v631_v38 = vadd.f32 %v1224_v37, %v1039_v18  ;;  %v622_v39 = vpop.f32.mrb[7].mxu1  ;;  %1250 = vmatmul.mubr.bf16.vlgmr.msra.gmra.mrb[16].mxu0 %v683_v31  ;;  %v672_v41 = vmax.f32 %v628_v34, 0.0 }
 0x1d7   : > { %v623_v40 = vadd.f32 %v1039_v18, %v622_v39  ;;  %v670_v43 = vmax.f32 %v620_v36, 0.0 }
 0x1d8   : > { %v673_v42 = vmax.f32 %v631_v38, 0.0 }
 0x1d9   : > { %v671_v44 = vmax.f32 %v623_v40, 0.0 }
 0x1da   : > { %v685_v45 = vpack.c.bf16 %v673_v42, %v672_v41 }
 0x1db   : > { %v684_v46 = vpack.c.bf16 %v671_v44, %v670_v43  ;;  %v1227_v47 = vpop.f32.mrb[8].mxu1 }
 0x1dc   : > { %v644_v48 = vadd.f32 %v1227_v47, %v1039_v18  ;;  %v635_v49 = vpop.f32.mrb[9].mxu1 }
 0x1dd   : > { %v636_v50 = vadd.f32 %v1039_v18, %v635_v49  ;;  %v1228_v51 = vpop.f32.mrb[10].mxu1  ;;  %1253 = vmatprep.mubr.bf16.mxu0 %v684_v46 }
 0x1de   : > { %v647_v52 = vadd.f32 %v1228_v51, %v1039_v18  ;;  %v638_v53 = vpop.f32.mrb[11].mxu1  ;;  %1254 = vmatmul.mubr.bf16.gmra.mrb[20].mxu0 %v685_v45  ;;  %v676_v55 = vmax.f32 %v644_v48, 0.0 }
 0x1df   : > { %v639_v54 = vadd.f32 %v1039_v18, %v638_v53  ;;  %v674_v57 = vmax.f32 %v636_v50, 0.0 }
 0x1e0   : > { %v677_v56 = vmax.f32 %v647_v52, 0.0 }
 0x1e1   : > { %v675_v58 = vmax.f32 %v639_v54, 0.0 }
 0x1e2   : > { %v687_v59 = vpack.c.bf16 %v677_v56, %v676_v55 }
 0x1e3   : > { %v686_v60 = vpack.c.bf16 %v675_v58, %v674_v57  ;;  %v1231_v61 = vpop.f32.mrb[12].mxu1 }
 0x1e4   : > { %v660_v62 = vadd.f32 %v1231_v61, %v1039_v18  ;;  %v651_v63 = vpop.f32.mrb[13].mxu1 }
 0x1e5   : > { %v652_v0 = vadd.f32 %v1039_v18, %v651_v63  ;;  %v1232_v1 = vpop.f32.mrb[14].mxu1  ;;  %1257 = vmatprep.mubr.bf16.mxu0 %v686_v60 }
 0x1e6   : > { %v663_v2 = vadd.f32 %v1232_v1, %v1039_v18  ;;  %v654_v3 = vpop.f32.mrb[15].mxu1  ;;  %1258 = vmatmul.mubr.bf16.gmra.mrb[24].mxu0 %v687_v59  ;;  %v680_v5 = vmax.f32 %v660_v62, 0.0 }
 0x1e7   : > { %v655_v4 = vadd.f32 %v1039_v18, %v654_v3  ;;  %v678_v7 = vmax.f32 %v652_v0, 0.0 }
 0x1e8   : > { %v681_v6 = vmax.f32 %v663_v2, 0.0 }
 0x1e9   : > { %v679_v8 = vmax.f32 %v655_v4, 0.0 }
 0x1ea   : > { %v689_v9 = vpack.c.bf16 %v681_v6, %v680_v5 }
 0x1eb   : > { %v688_v10 = vpack.c.bf16 %v679_v8, %v678_v7 }
 0x1ed   : > { %1261 = vmatprep.mubr.bf16.mxu0 %v688_v10 }
 0x1ee   : > { %1262 = vmatmul.mubr.bf16.gmra.mrb[28].mxu0 %v689_v9 }
 0x2a9   : > { %v1251_v11 = vpop.f32.mrb[16].mxu0 }
 0x2aa   : > { %v795_v13 = vpop.f32.mrb[17].mxu0  ;;  %v804_v15 = vadd.f32 %v1251_v11, %v1048_v12 }
 0x2ab   : > { %v1252_v14 = vpop.f32.mrb[18].mxu0  ;;  %v796_v18 = vadd.f32 %v1048_v12, %v795_v13 }
 0x2ac   : > { %v807_v16 = vadd.f32 %v1252_v14, %v1048_v12  ;;  %v798_v17 = vpop.f32.mrb[19].mxu0 }
 0x2ad   : > { %v799_v19 = vadd.f32 %v1048_v12, %v798_v17 }
 0x2ae   : > { %v1103_v20 = vpack.c.bf16 %v807_v16, %v804_v15 }
 0x2af   : > { %v1098_v21 = vpack.c.bf16 %v799_v19, %v796_v18 }
 0x2b0   : > { %1135 = vst [vmem:[%s1561_s18 + $0x8] sm:$0xff] %v1103_v20  }
 0x2b1   : > { %1099 = vst [vmem:[%s1561_s18] sm:$0xff] %v1098_v21   ;;  %v1255_v22 = vpop.f32.mrb[20].mxu0 }
 0x2b2   : > { %v811_v23 = vpop.f32.mrb[21].mxu0  ;;  %v820_v25 = vadd.f32 %v1255_v22, %v1048_v12 }
 0x2b3   : > { %v1256_v24 = vpop.f32.mrb[22].mxu0  ;;  %v812_v28 = vadd.f32 %v1048_v12, %v811_v23 }
 0x2b4   : > { %v823_v26 = vadd.f32 %v1256_v24, %v1048_v12  ;;  %v814_v27 = vpop.f32.mrb[23].mxu0 }
 0x2b5   : > { %v815_v29 = vadd.f32 %v1048_v12, %v814_v27 }
 0x2b6   : > { %v1113_v30 = vpack.c.bf16 %v823_v26, %v820_v25 }
 0x2b7   : > { %v1108_v31 = vpack.c.bf16 %v815_v29, %v812_v28 }
 0x2b8   : > { %1137 = vst [vmem:[%s1561_s18 + $0x18] sm:$0xff] %v1113_v30  }
 0x2b9   : > { %1136 = vst [vmem:[%s1561_s18 + $0x10] sm:$0xff] %v1108_v31   ;;  %v1259_v32 = vpop.f32.mrb[24].mxu0 }
 0x2ba   : > { %v827_v33 = vpop.f32.mrb[25].mxu0  ;;  %v836_v35 = vadd.f32 %v1259_v32, %v1048_v12 }
 0x2bb   : > { %v1260_v34 = vpop.f32.mrb[26].mxu0  ;;  %v828_v38 = vadd.f32 %v1048_v12, %v827_v33 }
 0x2bc   : > { %v839_v36 = vadd.f32 %v1260_v34, %v1048_v12  ;;  %v830_v37 = vpop.f32.mrb[27].mxu0 }
 0x2bd   : > { %v831_v39 = vadd.f32 %v1048_v12, %v830_v37 }
 0x2be   : > { %v1123_v40 = vpack.c.bf16 %v839_v36, %v836_v35 }
 0x2bf   : > { %v1118_v41 = vpack.c.bf16 %v831_v39, %v828_v38 }
 0x2c0   : > { %1139 = vst [vmem:[%s1561_s18 + $0x28] sm:$0xff] %v1123_v40  }
 0x2c1   : > { %1138 = vst [vmem:[%s1561_s18 + $0x20] sm:$0xff] %v1118_v41   ;;  %v1263_v42 = vpop.f32.mrb[28].mxu0 }
 0x2c2   : > { %v843_v43 = vpop.f32.mrb[29].mxu0  ;;  %v852_v45 = vadd.f32 %v1263_v42, %v1048_v12 }
 0x2c3   : > { %v1264_v44 = vpop.f32.mrb[30].mxu0  ;;  %v844_v48 = vadd.f32 %v1048_v12, %v843_v43 }
 0x2c4   : > { %v855_v46 = vadd.f32 %v1264_v44, %v1048_v12  ;;  %v846_v47 = vpop.f32.mrb[31].mxu0 }
 0x2c5   : > { %v847_v49 = vadd.f32 %v1048_v12, %v846_v47 }
 0x2c6   : > { %v1133_v50 = vpack.c.bf16 %v855_v46, %v852_v45 }
 0x2c7   : > { %v1128_v51 = vpack.c.bf16 %v847_v49, %v844_v48 }
 0x2c8   : > { %1141 = vst [vmem:[%s1561_s18 + $0x38] sm:$0xff] %v1133_v50  }
 0x2c9   : > { %1140 = vst [vmem:[%s1561_s18 + $0x30] sm:$0xff] %v1128_v51  }
 0x2ca   : > { %1344 = shalt.err (!%p1341_p3)
}
 0x2cb   : > { %s1345_s14 = scalar_lea.hbm %s1574_s29, 1024  ;;  %s1349_s17 = scalar_lea.hbm %s1630_s7, 2048 }
 0x2cc   : > { %p1346_p4 = scmp.ne.s32.totalorder %s1574_s29, %s1345_s14  ;;  %p1350_p9 = scmp.lt.u32.totalorder %s1574_s29, %s1630_s7 }
 0x2cd   : > { %p1351_p10 = scmp.lt.u32.totalorder %s1349_s17, %s1345_s14  ;;  %p1353_p12 = scmp.lt.u32.totalorder %s1345_s14, %s1574_s29 }
 0x2ce   : > { %p1347_p7 = pnand %p1346_p4, %p1476_p5 }
 0x2cf   : > { %p1352_p11 = por %p1351_p10, %p1350_p9 }
 0x2d0   : > { %p1348_p8 = pneg %p1347_p7 }
 0x2d1   : > { %p1354_p13 = por %p1353_p12, %p1352_p11 }
 0x2d3   : > { %p1355_p0 = pnand %p1354_p13, %p1348_p8 }
 0x2d5   : > { %1358 = shalt.err (!%p1355_p0)
}
 0x2d6   : > { %s1396_s21 = smov 64   ;;  %s1397_s22 = smov 4  }
 0x2d7   : > { %1265 = dma.vmem_to_hbm [thread:$0]  (%p1476_p5), %s1576_s20, 1024, %s1574_s29, %s1582_s28, %s1396_s21, %s1396_s21, %s1397_s22  }
 0x2d8 PF: > { %p1271_p1 = scmp.ge.s32.totalorder %s1393_s27, 2  ;;  %s967_s8 = sand.u32 1, %s1381_s24  }
 0x2d9   : > { %s968_s23 = scalar_lea.sflag [#allocation3], %s967_s8 }
 0x2da   : > { %p1268_p2 = pnand %p1271_p1, %p1480_p6 }
 0x2dc   : > { %1376 = dma.done.wait (!%p1268_p2), %s968_s23, 1024  }
 0x2dd   : > { %1378 = vsyncadd (!%p1268_p2), %s968_s23, 4294966272  ;;  %p17_p3 = scmp.ge.s32.totalorder %s1463_s30, 4   ;;  %s1633_s24 = smov %s1385_s25 }
 0x2de   : > { %s1634_s25 = smov %s1389_s26  ;;  %s1635_s26 = smov %s1474_s10 }
 0x2df   : > { %s1636_s27 = smov %s1463_s30  ;;  %19 = sbr.rel (!%p17_p3) target bundleno = 3 (0x3), region = 83 }
 0x2e6   :  { %973 = vsyncpa [#allocation3], 1 }
 0x2e7   :  { %975 = vsyncpa [#allocation3 + $0x1], 1 }

</bundles_post_ra>
